<compile_context>
chip_gen: v7x
topology: tpu7x:2x2x1
jax: 0.10.0
libtpu: 0.0.40
codegen_flags: <defaults>
</compile_context>

<pallas_src>
import functools

import jax
import jax.numpy as jnp
from jax.experimental import pallas as pl
from jax.experimental.pallas import tpu as pltpu


def _round_up(x, m):
    return (x + m - 1) // m * m


def _actor_kernel(x_ref, p1_ref, p2_ref, p3_ref, o_ref, *, max_action):
    """One batch tile of the fused 3-layer Actor.

    Every layer is a single MXU matmul (bf16 inputs, f32 accumulation).
    Biases are folded in:
      * the input tile carries a ones column at index S          -> + b1
      * p1's bias row puts a 1.0 at column H1, so h1[:, H1] == 1 -> + b2
      * p2's bias row puts a 1.0 at column H2, so h2[:, H2] == 1 -> + b3
    ReLU keeps those 1.0 "bias lanes" intact, so no VALU bias adds remain.
    """
    x = x_ref[...].astype(jnp.bfloat16)                              # (TB, SP)
    h1 = jnp.maximum(
        jnp.dot(x, p1_ref[...], preferred_element_type=jnp.float32), 0.0)
    h2 = jnp.maximum(
        jnp.dot(h1.astype(jnp.bfloat16), p2_ref[...],
                preferred_element_type=jnp.float32), 0.0)
    h3 = jnp.dot(h2.astype(jnp.bfloat16), p3_ref[...],
                 preferred_element_type=jnp.float32)
    o_ref[...] = (max_action * jnp.tanh(h3)).astype(o_ref.dtype)


def init_actor_params(key, state_dim, action_dim):
    """f32 params mimicking PyTorch nn.Linear default init, stored [in, out]."""
    def linear(key, fan_in, fan_out):
        kw, kb = jax.random.split(key)
        bound = 1.0 / jnp.sqrt(jnp.float32(fan_in))
        w = jax.random.uniform(kw, (fan_in, fan_out), jnp.float32, -bound, bound)
        b = jax.random.uniform(kb, (1, fan_out), jnp.float32, -bound, bound)
        return w, b

    k1, k2, k3 = jax.random.split(key, 3)
    w1, b1 = linear(k1, state_dim, 400)
    w2, b2 = linear(k2, 400, 300)
    w3, b3 = linear(k3, 300, action_dim)
    return dict(w1=w1, b1=b1, w2=w2, b2=b2, w3=w3, b3=b3)


def pack_actor_params(params):
    """Pack f32 params into 3 lane-padded bf16 buffers with fused bias lanes.

      p1: (SP,  H1P)  rows 0..S-1 = W1, row S  = b1, plus p1[S,  H1] = 1.0
      p2: (H1P, H2P)  rows 0..H1-1= W2, row H1 = b2, plus p2[H1, H2] = 1.0
      p3: (H2P, AP)   rows 0..H2-1= W3, row H2 = b3
    """
    w1, b1 = params["w1"], params["b1"]
    w2, b2 = params["w2"], params["b2"]
    w3, b3 = params["w3"], params["b3"]
    S, H1 = w1.shape
    H2 = w2.shape[1]
    A = w3.shape[1]
    SP = _round_up(S + 1, 8)          # state cols + ones column, sublane pad
    H1P = _round_up(H1 + 1, 128)      # +1 spare column = layer-2 bias lane
    H2P = _round_up(H2 + 1, 128)      # +1 spare column = layer-3 bias lane
    AP = _round_up(A, 128)

    p1 = jnp.zeros((SP, H1P), jnp.float32)
    p1 = p1.at[:S, :H1].set(w1).at[S, :H1].set(b1[0]).at[S, H1].set(1.0)

    p2 = jnp.zeros((H1P, H2P), jnp.float32)
    p2 = p2.at[:H1, :H2].set(w2).at[H1, :H2].set(b2[0]).at[H1, H2].set(1.0)

    p3 = jnp.zeros((H2P, AP), jnp.float32)
    p3 = p3.at[:H2, :A].set(w3).at[H2, :A].set(b3[0])

    return dict(p1=p1.astype(jnp.bfloat16),
                p2=p2.astype(jnp.bfloat16),
                p3=p3.astype(jnp.bfloat16),
                state_dim=int(S), action_dim=int(A))


def actor_forward(state, packed, max_action):
    """Fused 3-layer Actor forward pass on TPU via Pallas."""
    B, S = state.shape
    assert S == packed["state_dim"]
    A = packed["action_dim"]
    p1, p2, p3 = packed["p1"], packed["p2"], packed["p3"]
    SP = p1.shape[0]
    AP = p3.shape[1]

    # Batch tile selection:
    #   * B < 512  : one tile (minimize grid-step overhead).
    #   * B >= 512 : >= 2 tiles (engage both v7x TensorCores), capped at 1024
    #                rows (~6 MB VMEM/tile, fits default scoped VMEM on
    #                v5e/v6e/v7x). max_action / shapes are compile-time consts.
    if B < 512:
        tb = _round_up(max(B, 1), 8)
    else:
        tb = min(1024, _round_up(_round_up(B, 8) // 2, 128))
    b_pad = _round_up(B, tb)

    # Pad state to (b_pad, SP) with a ones column at index S: folds b1 into the
    # layer-1 matmul and (via p1's bias lane) b2/b3 into layers 2/3.
    x = jnp.zeros((b_pad, SP), jnp.float32)
    x = x.at[:B, :S].set(state.astype(jnp.float32))
    x = x.at[:, S].set(1.0)

    kernel = functools.partial(_actor_kernel, max_action=float(max_action))

    out = pl.pallas_call(
        kernel,
        out_shape=jax.ShapeDtypeStruct((b_pad, AP), jnp.bfloat16),
        grid=(b_pad // tb,),
        in_specs=[
            pl.BlockSpec((tb, SP), lambda i: (i, 0)),
            pl.BlockSpec(p1.shape, lambda i: (0, 0)),   # resident across tiles
            pl.BlockSpec(p2.shape, lambda i: (0, 0)),
            pl.BlockSpec(p3.shape, lambda i: (0, 0)),
        ],
        out_specs=pl.BlockSpec((tb, AP), lambda i: (i, 0)),
        compiler_params=pltpu.CompilerParams(
            dimension_semantics=("parallel",)),
    )(x, p1, p2, p3)
    return out[:B, :A].astype(jnp.float32)


def actor_forward_ref(state, params, max_action):
    """Pure-JAX f32 reference (matches the PyTorch module)."""
    h1 = jnp.maximum(state @ params["w1"] + params["b1"], 0.0)
    h2 = jnp.maximum(h1 @ params["w2"] + params["b2"], 0.0)
    return max_action * jnp.tanh(h2 @ params["w3"] + params["b3"])


if __name__ == "__main__":
    # Pendulum-v1: state_dim=3, action_dim=1, max_action=2.0
    state_dim, action_dim, max_action = 3, 1, 2.0

    key = jax.random.PRNGKey(0)
    k_params, k_state = jax.random.split(key)
    params = init_actor_params(k_params, state_dim, action_dim)
    packed = pack_actor_params(params)

    # Small inference-style batch (exercises the single-tile path).
    for batch in (8, 37):   # 37 also exercises batch padding + output slicing
        k_state, k_use = jax.random.split(k_state)
        state = jax.random.normal(k_use, (batch, state_dim), jnp.float32)

        out = jax.block_until_ready(actor_forward(state, packed, max_action))
        ref = actor_forward_ref(state, params, max_action)

        assert out.shape == (batch, action_dim)
        # bf16 weights/activations -> looser tolerance vs the f32 reference.
        assert jnp.allclose(out, ref, atol=5e-2, rtol=5e-2), (
            f"mismatch vs reference (B={batch}), "
            f"max abs diff {jnp.max(jnp.abs(out - ref))}")

    print("KERNEL_OK")
</pallas_src>

<mosaic_0001>
module attributes {stable_mosaic.version = 11 : i64} {
  func.func @_actor_kernel(%arg0: i32, %arg1: memref<8x8xf32, #tpu.memory_space<vmem>>, %arg2: memref<8x512xbf16, #tpu.memory_space<vmem>>, %arg3: memref<512x384xbf16, #tpu.memory_space<vmem>>, %arg4: memref<384x128xbf16, #tpu.memory_space<vmem>>, %arg5: memref<8x128xbf16, #tpu.memory_space<vmem>>) attributes {dimension_semantics = [#tpu.dimension_semantics<parallel>], iteration_bounds = array<i64: 1>, scalar_prefetch = 0 : i64, scratch_operands = 0 : i64, tpu.core_type = #tpu.core_type<tc>, window_params = [{transform_indices = @transform_0, window_bounds = array<i64: 8, 8>}, {pipeline_mode = #tpu.pipeline_mode<synchronous>, transform_indices = @transform_1, window_bounds = array<i64: 8, 512>}, {pipeline_mode = #tpu.pipeline_mode<synchronous>, transform_indices = @transform_2, window_bounds = array<i64: 512, 384>}, {pipeline_mode = #tpu.pipeline_mode<synchronous>, transform_indices = @transform_3, window_bounds = array<i64: 384, 128>}, {transform_indices = @transform_4, window_bounds = array<i64: 8, 128>}]} {
    %c0 = arith.constant 0 : index
    %c0_0 = arith.constant 0 : index
    %0 = vector.load %arg1[%c0, %c0_0] : memref<8x8xf32, #tpu.memory_space<vmem>>, vector<8x8xf32>
    %1 = arith.truncf %0 : vector<8x8xf32> to vector<8x8xbf16>
    %c0_1 = arith.constant 0 : index
    %c0_2 = arith.constant 0 : index
    %2 = vector.load %arg2[%c0_1, %c0_2] : memref<8x512xbf16, #tpu.memory_space<vmem>>, vector<8x512xbf16>
    %cst = arith.constant dense<0.000000e+00> : vector<8x512xf32>
    %3 = tpu.matmul %1, %2, %cst {dimension_numbers = #tpu.dot_dimension_numbers<[1], [0], [0], [1], [0, 0, 1, 1], [], []>} : vector<8x8xbf16>, vector<8x512xbf16>, vector<8x512xf32> -> vector<8x512xf32>
    %cst_3 = arith.constant 0.000000e+00 : f32
    %4 = vector.broadcast %cst_3 : f32 to vector<8x512xf32>
    %5 = arith.maximumf %3, %4 : vector<8x512xf32>
    %6 = arith.truncf %5 : vector<8x512xf32> to vector<8x512xbf16>
    %c0_4 = arith.constant 0 : index
    %c0_5 = arith.constant 0 : index
    %7 = vector.load %arg3[%c0_4, %c0_5] : memref<512x384xbf16, #tpu.memory_space<vmem>>, vector<512x384xbf16>
    %cst_6 = arith.constant dense<0.000000e+00> : vector<8x384xf32>
    %8 = tpu.matmul %6, %7, %cst_6 {dimension_numbers = #tpu.dot_dimension_numbers<[1], [0], [0], [1], [0, 0, 1, 1], [], []>} : vector<8x512xbf16>, vector<512x384xbf16>, vector<8x384xf32> -> vector<8x384xf32>
    %cst_7 = arith.constant 0.000000e+00 : f32
    %9 = vector.broadcast %cst_7 : f32 to vector<8x384xf32>
    %10 = arith.maximumf %8, %9 : vector<8x384xf32>
    %11 = arith.truncf %10 : vector<8x384xf32> to vector<8x384xbf16>
    %c0_8 = arith.constant 0 : index
    %c0_9 = arith.constant 0 : index
    %12 = vector.load %arg4[%c0_8, %c0_9] : memref<384x128xbf16, #tpu.memory_space<vmem>>, vector<384x128xbf16>
    %cst_10 = arith.constant dense<0.000000e+00> : vector<8x128xf32>
    %13 = tpu.matmul %11, %12, %cst_10 {dimension_numbers = #tpu.dot_dimension_numbers<[1], [0], [0], [1], [0, 0, 1, 1], [], []>} : vector<8x384xbf16>, vector<384x128xbf16>, vector<8x128xf32> -> vector<8x128xf32>
    %14 = math.tanh %13 : vector<8x128xf32>
    %cst_11 = arith.constant 2.000000e+00 : f32
    %15 = vector.broadcast %cst_11 : f32 to vector<8x128xf32>
    %16 = arith.mulf %15, %14 : vector<8x128xf32>
    %17 = arith.truncf %16 : vector<8x128xf32> to vector<8x128xbf16>
    %c0_12 = arith.constant 0 : index
    %c0_13 = arith.constant 0 : index
    %18 = vector.load %arg5[%c0_12, %c0_13] : memref<8x128xbf16, #tpu.memory_space<vmem>>, vector<8x128xbf16>
    tpu.vector_store %arg5[%c0_12, %c0_13], %17 {strides = array<i32>} : memref<8x128xbf16, #tpu.memory_space<vmem>>, vector<8x128xbf16>,
    return
  }
  func.func @transform_0(%arg0: i32) -> (i32, i32) {
    %c0_i32 = arith.constant 0 : i32
    %c0_i32_0 = arith.constant 0 : i32
    return %arg0, %c0_i32 : i32, i32
  }
  func.func @transform_1(%arg0: i32) -> (i32, i32) {
    %c0_i32 = arith.constant 0 : i32
    %c0_i32_0 = arith.constant 0 : i32
    %c0_i32_1 = arith.constant 0 : i32
    return %c0_i32, %c0_i32_0 : i32, i32
  }
  func.func @transform_2(%arg0: i32) -> (i32, i32) {
    %c0_i32 = arith.constant 0 : i32
    %c0_i32_0 = arith.constant 0 : i32
    %c0_i32_1 = arith.constant 0 : i32
    return %c0_i32, %c0_i32_0 : i32, i32
  }
  func.func @transform_3(%arg0: i32) -> (i32, i32) {
    %c0_i32 = arith.constant 0 : i32
    %c0_i32_0 = arith.constant 0 : i32
    %c0_i32_1 = arith.constant 0 : i32
    return %c0_i32, %c0_i32_0 : i32, i32
  }
  func.func @transform_4(%arg0: i32) -> (i32, i32) {
    %c0_i32 = arith.constant 0 : i32
    %c0_i32_0 = arith.constant 0 : i32
    return %arg0, %c0_i32 : i32, i32
  }
}

</mosaic_0001>

<bundles_post_ra>
// kernel: tpu_custom_call.1
= control target key start
LH: loop header
LB: loop body
LE: loop exit
PB: predicated region body
PF: predicated region fallthrough
CT: control target
= control target key end

     0   :  { %9 = vsyncpa [#allocation3], 0  ;;  %s1907_s0 = inlined_call_operand.hbm [shape: f32[8,8], index: 0, kind: input, shape index: {}]   ;;  %s1908_s1 = inlined_call_operand.hbm [shape: bf16[8,512], index: 1, kind: input, shape index: {}]   ;;  %s1909_s2 = inlined_call_operand.hbm [shape: bf16[512,384], index: 2, kind: input, shape index: {}]   ;;  %s1910_s3 = inlined_call_operand.hbm [shape: bf16[384,128], index: 3, kind: input, shape index: {}]   ;;  %s1911_s4 = inlined_call_operand.hbm [shape: bf16[8,128], index: 4, kind: output, shape index: {}]  }
   0x1   :  { %10 = vsyncpa [#allocation6], 0 }
   0x2   :  { %11 = vsyncpa [#allocation9], 0 }
   0x3   :  { %12 = vsyncpa [#allocation4], 0  ;;  %s1807_s15 = smov [#allocation5]   ;;  %s1808_s17 = smov [#allocation2]  }
   0x4   :  { %s29_s16 = sshll.u32 %s1807_s15, 4  ;;  %s19_s18 = sshll.u32 %s1808_s17, 4  ;;  %s30_s16 = int_to_ptr.vmem [resolvable:$true] %s29_s16  ;;  %s20_s18 = int_to_ptr.vmem [resolvable:$true] %s19_s18 }
   0x5   :  { %s1689_s21 = scalar_lea.hbm %s1908_s1, 256 }
   0x6   :  { %p1690_p0 = scmp.ne.s32.totalorder %s1908_s1, %s1689_s21  ;;  %p1693_p1 = scmp.lt.u32.totalorder %s1689_s21, %s1908_s1 }
   0x8   :  { %p1695_p2 = pnand %p1693_p1, %p1690_p0 }
   0xa   :  { %1698 = shalt.err (!%p1695_p2)
}
   0xb   :  { %s1699_s26 = scalar_lea.vmem %s30_s16, 256  ;;  %p1704_p4 = scmp.lt.s32.totalorder %s30_s16, %s30_s16 }
   0xc   :  { %p1700_p3 = scmp.ne.s32.totalorder %s30_s16, %s1699_s26  ;;  %p1705_p5 = scmp.lt.s32.totalorder %s1699_s26, %s1699_s26 }
   0xe   :  { %p1706_p6 = por %p1705_p5, %p1704_p4 }
  0x10   :  { %p1707_p7 = pnand %p1706_p6, %p1700_p3 }
  0x12   :  { %1710 = shalt.err (!%p1707_p7)
}
  0x13   :  { %32 = dma.hbm_to_vmem [thread:$0]  %s1908_s1, 256, %s30_s16, [#allocation6]  }
  0x14   :  { %s1711_s5 = scalar_lea.hbm %s1907_s0, 128 }
  0x15   :  { %p1712_p8 = scmp.ne.s32.totalorder %s1907_s0, %s1711_s5  ;;  %p1715_p9 = scmp.lt.u32.totalorder %s1711_s5, %s1907_s0 }
  0x17   :  { %p1717_p10 = pnand %p1715_p9, %p1712_p8 }
  0x19   :  { %1720 = shalt.err (!%p1717_p10)
}
  0x1a   :  { %s1721_s10 = scalar_lea.vmem %s20_s18, 128  ;;  %p1726_p12 = scmp.lt.s32.totalorder %s20_s18, %s20_s18 }
  0x1b   :  { %p1722_p11 = scmp.ne.s32.totalorder %s20_s18, %s1721_s10  ;;  %p1727_p13 = scmp.lt.s32.totalorder %s1721_s10, %s1721_s10 }
  0x1d   :  { %p1728_p0 = por %p1727_p13, %p1726_p12 }
  0x1f   :  { %p1729_p1 = pnand %p1728_p0, %p1722_p11 }
  0x21   :  { %1732 = shalt.err (!%p1729_p1)
}
  0x22   :  { %22 = dma.hbm_to_vmem [thread:$0]  %s1907_s0, 128, %s20_s18, [#allocation3]  }
  0x23   :  { %s1809_s12 = smov [#allocation7]   ;;  %s1733_s16 = scalar_lea.hbm %s1909_s2, 12288 }
  0x24   :  { %s38_s13 = sshll.u32 %s1809_s12, 4  ;;  %p1734_p2 = scmp.ne.s32.totalorder %s1909_s2, %s1733_s16  ;;  %s39_s13 = int_to_ptr.vmem [resolvable:$true] %s38_s13 }
  0x25   :  { %p1737_p3 = scmp.lt.u32.totalorder %s1733_s16, %s1909_s2 }
  0x27   :  { %p1739_p4 = pnand %p1737_p3, %p1734_p2 }
  0x29   :  { %1742 = shalt.err (!%p1739_p4)
}
  0x2a   :  { %s1743_s22 = scalar_lea.vmem %s39_s13, 12288  ;;  %p1748_p6 = scmp.lt.s32.totalorder %s39_s13, %s39_s13 }
  0x2b   :  { %p1744_p5 = scmp.ne.s32.totalorder %s39_s13, %s1743_s22  ;;  %p1749_p7 = scmp.lt.s32.totalorder %s1743_s22, %s1743_s22 }
  0x2d   :  { %p1750_p8 = por %p1749_p7, %p1748_p6 }
  0x2f   :  { %p1751_p9 = pnand %p1750_p8, %p1744_p5 }
  0x31   :  { %1754 = shalt.err (!%p1751_p9)
}
  0x32   :  { %s1810_s0 = smov 192   ;;  %s1811_s18 = smov 12  }
  0x33   :  { %44 = dma.hbm_to_vmem [thread:$0]  %s1909_s2, 12288, %s39_s13, [#allocation6], %s1810_s0, %s1810_s0, %s1811_s18  }
  0x34   :  { %s1812_s25 = smov [#allocation8]   ;;  %s1755_s29 = scalar_lea.hbm %s1910_s3, 3072 }
  0x35   :  { %s50_s26 = sshll.u32 %s1812_s25, 4  ;;  %p1756_p10 = scmp.ne.s32.totalorder %s1910_s3, %s1755_s29  ;;  %s51_s26 = int_to_ptr.vmem [resolvable:$true] %s50_s26 }
  0x36   :  { %p1759_p11 = scmp.lt.u32.totalorder %s1755_s29, %s1910_s3 }
  0x38   :  { %p1761_p12 = pnand %p1759_p11, %p1756_p10 }
  0x3a   :  { %1764 = shalt.err (!%p1761_p12)
}
  0x3b   :  { %s1765_s8 = scalar_lea.vmem %s51_s26, 3072  ;;  %p1770_p0 = scmp.lt.s32.totalorder %s51_s26, %s51_s26 }
  0x3c   :  { %p1766_p13 = scmp.ne.s32.totalorder %s51_s26, %s1765_s8  ;;  %p1771_p1 = scmp.lt.s32.totalorder %s1765_s8, %s1765_s8 }
  0x3e   :  { %p1772_p2 = por %p1771_p1, %p1770_p0 }
  0x40   :  { %p1773_p3 = pnand %p1772_p2, %p1766_p13 }
  0x42   :  { %1776 = shalt.err (!%p1773_p3)
}
  0x43   :  { %s1813_s2 = smov 64   ;;  %s1814_s9 = smov 4  }
  0x44   :  { %56 = dma.hbm_to_vmem [thread:$0]  %s1910_s3, 3072, %s51_s26, [#allocation9], %s1813_s2, %s1813_s2, %s1814_s9  }
  0x45   :  { %1799 = dma.done.wait [#allocation3], 128  }
  0x46   :  { %1800 = vsyncadd [#allocation3], 4294967168 }
  0x47   :  { %1801 = dma.done.wait [#allocation6], 12544  }
  0x48   :  { %1802 = vsyncadd [#allocation6], 4294954752 }
  0x49   :  { %1803 = dma.done.wait [#allocation9], 3072  }
  0x4a   :  { %1804 = vsyncadd [#allocation9], 4294964224  ;;  %v1815_v0 = vmov 0   ;;  %v72_v1 = vld [vmem:[#allocation5] sm:$0xff]  ;;  %vm88_vm0 = vcmask 1043456   ;;  %v70_v2 = vld [vmem:[#allocation2] sm:$0xff] }
  0x4b   :  { %133 = vmatprep.mubr.bf16.mxu0 %v1815_v0  ;;  %174 = vmatprep.mubr.bf16.mxu1 %v1815_v0  ;;  %v73_v3 = vld [vmem:[#allocation5 + $0x8] sm:$0xff]  ;;  %v1293_v4 = vcombine.high %v72_v1, %v72_v1  ;;  %v1292_v5 = vcombine.low %v72_v1, %v72_v1  ;;  %v1537_v8 = vld [vmem:[#allocation7 + $0x4] ss:$12 sps:$4 sm:$0xff]   ;;  %v71_v10 = vpack.c.bf16 %v70_v2, %v70_v2  ;;  %vm84_vm1 = vcmask 64512   ;;  %v1535_v12 = vld [vmem:[#allocation7] ss:$12 sps:$4 sm:$0xff]  }
  0x4c   :  { %v1295_v6 = vcombine.high %v73_v3, %v73_v3  ;;  %v1294_v7 = vcombine.low %v73_v3, %v73_v3  ;;  %v1540_v13 = vld [vmem:[#allocation7 + $0x1c] ss:$12 sps:$4 sm:$0xff]   ;;  %v1538_v14 = vld [vmem:[#allocation7 + $0x18] ss:$12 sps:$4 sm:$0xff]   ;;  %v1543_v15 = vld [vmem:[#allocation7 + $0x34] ss:$12 sps:$4 sm:$0xff]  }
  0x4d   :  { %1296 = vmatprep.subr.msk.bf16.mxu0 %vm88_vm0, %v1293_v4  ;;  %v90_v9 = vsel %vm88_vm0, %v1292_v5, 0  ;;  %v1541_v16 = vld [vmem:[#allocation7 + $0x30] ss:$12 sps:$4 sm:$0xff]   ;;  %v1546_v17 = vld [vmem:[#allocation7 + $0x4c] ss:$12 sps:$4 sm:$0xff]   ;;  %vm1817_vm2 = vmmov 0  }
  0x4e   :  { %1298 = vmatprep.subr.msk.bf16.mxu1 %vm88_vm0, %v1295_v6  ;;  %102 = vmatpush1.bf16.msra.mxu0 %v90_v9  ;;  %v96_v11 = vsel %vm88_vm0, %v1294_v7, 0  ;;  %v1562_v18 = vld [vmem:[#allocation7 + $0xc8] ss:$12 sps:$4 sm:$0xff]   ;;  %v1549_v21 = vld [vmem:[#allocation7 + $0x64] ss:$12 sps:$4 sm:$0xff]   ;;  %s1818_s3 = smov [#allocation10]  }
  0x4f   :  { %143 = vmatpush1.bf16.msra.mxu1 %v96_v11  ;;  %831 = vmatprep.subr.bf16.mxu0 %v1537_v8  ;;  %v1563_v19 = vld [vmem:[#allocation7 + $0x8] ss:$12 sps:$4 sm:$0xff]   ;;  %v1567_v22 = vld [vmem:[#allocation7 + $0xe0] ss:$12 sps:$4 sm:$0xff]   ;;  %v1572_v26 = vld [vmem:[#allocation7 + $0xf8] ss:$12 sps:$4 sm:$0xff]  }
  0x50   :  { %v1544_v20 = vld [vmem:[#allocation7 + $0x48] ss:$12 sps:$4 sm:$0xff]   ;;  %1420 = vmatprep.subr.bf16.mxu1 %v1562_v18  ;;  %v1568_v23 = vld [vmem:[#allocation7 + $0x20] ss:$12 sps:$4 sm:$0xff]   ;;  %v1573_v27 = vld [vmem:[#allocation7 + $0x38] ss:$12 sps:$4 sm:$0xff]  }
  0x51   :  { %1297 = vmatmul.mubr.msk.bf16.vlgmr.msra.gmra.mrb[0].mxu0 %vm84_vm1, %v71_v10  ;;  %v1547_v24 = vld [vmem:[#allocation7 + $0x60] ss:$12 sps:$4 sm:$0xff]   ;;  %v1552_v25 = vld [vmem:[#allocation7 + $0x7c] ss:$12 sps:$4 sm:$0xff]   ;;  %v1550_v28 = vld [vmem:[#allocation7 + $0x78] ss:$12 sps:$4 sm:$0xff]  }
  0x52   :  { %1299 = vmatmul.mubr.msk.bf16.vlgmr.msra.gmra.mrb[0].mxu1 %vm84_vm1, %v71_v10  ;;  %832 = vmatpush1.bf16.msra.mxu0 %v1535_v12  ;;  %v1577_v29 = vld [vmem:[#allocation7 + $0x110] ss:$12 sps:$4 sm:$0xff]   ;;  %v1555_v31 = vld [vmem:[#allocation7 + $0x94] ss:$12 sps:$4 sm:$0xff]   ;;  %v1558_v35 = vld [vmem:[#allocation7 + $0xac] ss:$12 sps:$4 sm:$0xff]  }
  0x53   :  { %833 = vmatprep.subr.bf16.mxu0 %v1540_v13  ;;  %1421 = vmatpush3.bf16.msra.mxu1 %v1563_v19  ;;  %v1578_v30 = vld [vmem:[#allocation7 + $0x50] ss:$12 sps:$4 sm:$0xff]   ;;  %v1582_v33 = vld [vmem:[#allocation7 + $0x128] ss:$12 sps:$4 sm:$0xff]   ;;  %v1587_v36 = vld [vmem:[#allocation7 + $0x140] ss:$12 sps:$4 sm:$0xff]  }
  0x54   :  { %1422 = vmatprep.subr.bf16.mxu1 %v1567_v22  ;;  %v1553_v32 = vld [vmem:[#allocation7 + $0x90] ss:$12 sps:$4 sm:$0xff]   ;;  %v1583_v34 = vld [vmem:[#allocation7 + $0x68] ss:$12 sps:$4 sm:$0xff]   ;;  %v1588_v39 = vld [vmem:[#allocation7 + $0x80] ss:$12 sps:$4 sm:$0xff]  }
  0x55   :  { %v1556_v37 = vld [vmem:[#allocation7 + $0xa8] ss:$12 sps:$4 sm:$0xff]   ;;  %v1561_v38 = vld [vmem:[#allocation7 + $0xc4] ss:$12 sps:$4 sm:$0xff]   ;;  %v1559_v41 = vld [vmem:[#allocation7 + $0xc0] ss:$12 sps:$4 sm:$0xff]  }
  0x56   :  { %834 = vmatpush1.bf16.msra.mxu0 %v1538_v14  ;;  %v1592_v40 = vld [vmem:[#allocation7 + $0x158] ss:$12 sps:$4 sm:$0xff]   ;;  %v1566_v43 = vld [vmem:[#allocation7 + $0xdc] ss:$12 sps:$4 sm:$0xff]   ;;  %v1571_v45 = vld [vmem:[#allocation7 + $0xf4] ss:$12 sps:$4 sm:$0xff]  }
  0x57   :  { %835 = vmatprep.subr.bf16.mxu0 %v1543_v15  ;;  %1423 = vmatpush3.bf16.msra.mxu1 %v1568_v23  ;;  %v1593_v42 = vld [vmem:[#allocation7 + $0x98] ss:$12 sps:$4 sm:$0xff]   ;;  %v1569_v46 = vld [vmem:[#allocation7 + $0xf0] ss:$12 sps:$4 sm:$0xff]   ;;  %v1574_v48 = vld [vmem:[#allocation7 + $0x108] ss:$12 sps:$4 sm:$0xff]  }
  0x58   :  { %1424 = vmatprep.subr.bf16.mxu1 %v1572_v26  ;;  %v1564_v44 = vld [vmem:[#allocation7 + $0xd8] ss:$12 sps:$4 sm:$0xff]   ;;  %v1579_v50 = vld [vmem:[#allocation7 + $0x120] ss:$12 sps:$4 sm:$0xff]   ;;  %v1586_v51 = vld [vmem:[#allocation7 + $0x13c] ss:$12 sps:$4 sm:$0xff]  }
  0x59   :  { %v1576_v47 = vld [vmem:[#allocation7 + $0x10c] ss:$12 sps:$4 sm:$0xff]   ;;  %v1581_v49 = vld [vmem:[#allocation7 + $0x124] ss:$12 sps:$4 sm:$0xff]   ;;  %v1591_v53 = vld [vmem:[#allocation7 + $0x154] ss:$12 sps:$4 sm:$0xff]  }
  0x5a   :  { %836 = vmatpush1.bf16.msra.mxu0 %v1541_v16  ;;  %v1584_v52 = vld [vmem:[#allocation7 + $0x138] ss:$12 sps:$4 sm:$0xff]   ;;  %v1589_v54 = vld [vmem:[#allocation7 + $0x150] ss:$12 sps:$4 sm:$0xff]   ;;  %v1594_v57 = vld [vmem:[#allocation7 + $0x168] ss:$12 sps:$4 sm:$0xff]  }
  0x5b   :  { %837 = vmatprep.subr.bf16.mxu0 %v1546_v17  ;;  %1425 = vmatpush3.bf16.msra.mxu1 %v1573_v27  ;;  %v1596_v55 = vld [vmem:[#allocation7 + $0x16c] ss:$12 sps:$4 sm:$0xff]   ;;  %v1597_v56 = vld [vmem:[#allocation7 + $0x170] ss:$12 sps:$4 sm:$0xff]   ;;  %v1602_v60 = vld [vmem:[#allocation7 + $0x248] ss:$12 sps:$4 sm:$0xff]  }
  0x5c   :  { %1426 = vmatprep.subr.bf16.mxu1 %v1577_v29  ;;  %v1598_v58 = vld [vmem:[#allocation7 + $0xb0] ss:$12 sps:$4 sm:$0xff]   ;;  %v1599_v8 = vld [vmem:[#allocation7 + $0x180] ss:$12 sps:$4 sm:$0xff]   ;;  %v1603_v9 = vld [vmem:[#allocation7 + $0x188] ss:$12 sps:$4 sm:$0xff]  }
  0x5d   :  { %v1601_v59 = vld [vmem:[#allocation7 + $0x184] ss:$12 sps:$4 sm:$0xff]   ;;  %v1606_v12 = vld [vmem:[#allocation7 + $0x19c] ss:$12 sps:$4 sm:$0xff]   ;;  %v1607_v13 = vld [vmem:[#allocation7 + $0x260] ss:$12 sps:$4 sm:$0xff]  }
  0x5e   :  { %838 = vmatpush1.bf16.msra.mxu0 %v1544_v20  ;;  %v1604_v15 = vld [vmem:[#allocation7 + $0x198] ss:$12 sps:$4 sm:$0xff]   ;;  %v1608_v16 = vld [vmem:[#allocation7 + $0x1a0] ss:$12 sps:$4 sm:$0xff]   ;;  %v1609_v19 = vld [vmem:[#allocation7 + $0x1b0] ss:$12 sps:$4 sm:$0xff]  }
  0x5f   :  { %839 = vmatprep.subr.bf16.mxu0 %v1549_v21  ;;  %1427 = vmatpush3.bf16.msra.mxu1 %v1578_v30  ;;  %v1611_v17 = vld [vmem:[#allocation7 + $0x1b4] ss:$12 sps:$4 sm:$0xff]   ;;  %v1612_v18 = vld [vmem:[#allocation7 + $0x278] ss:$12 sps:$4 sm:$0xff]   ;;  %v1617_v22 = vld [vmem:[#allocation7 + $0x290] ss:$12 sps:$4 sm:$0xff]  }
  0x60   :  { %1428 = vmatprep.subr.bf16.mxu1 %v1582_v33  ;;  %v1613_v20 = vld [vmem:[#allocation7 + $0x1b8] ss:$12 sps:$4 sm:$0xff]   ;;  %v1614_v23 = vld [vmem:[#allocation7 + $0x1c8] ss:$12 sps:$4 sm:$0xff]   ;;  %v1619_v27 = vld [vmem:[#allocation7 + $0x1e0] ss:$12 sps:$4 sm:$0xff]  }
  0x61   :  { %v1616_v21 = vld [vmem:[#allocation7 + $0x1cc] ss:$12 sps:$4 sm:$0xff]   ;;  %v1622_v26 = vld [vmem:[#allocation7 + $0x2a8] ss:$12 sps:$4 sm:$0xff]   ;;  %s1281_s11 = sshll.u32 %s1818_s3, 4  ;;  %s1282_s11 = int_to_ptr.vmem [resolvable:$true] %s1281_s11 }
  0x62   :  { %840 = vmatpush1.bf16.msra.mxu0 %v1547_v24  ;;  %v1618_v24 = vld [vmem:[#allocation7 + $0x1d0] ss:$12 sps:$4 sm:$0xff]   ;;  %v1627_v30 = vld [vmem:[#allocation7 + $0x2c0] ss:$12 sps:$4 sm:$0xff]   ;;  %s1777_s12 = scalar_lea.vmem %s1282_s11, 64  ;;  %p1782_p5 = scmp.lt.s32.totalorder %s1282_s11, %s1282_s11 }
  0x63   :  { %841 = vmatprep.subr.bf16.mxu0 %v1552_v25  ;;  %1429 = vmatpush3.bf16.msra.mxu1 %v1583_v34  ;;  %v1621_v25 = vld [vmem:[#allocation7 + $0x1e4] ss:$12 sps:$4 sm:$0xff]   ;;  %v1626_v29 = vld [vmem:[#allocation7 + $0x1fc] ss:$12 sps:$4 sm:$0xff]   ;;  %v1631_v33 = vld [vmem:[#allocation7 + $0x214] ss:$12 sps:$4 sm:$0xff]   ;;  %p1778_p4 = scmp.ne.s32.totalorder %s1282_s11, %s1777_s12  ;;  %p1783_p6 = scmp.lt.s32.totalorder %s1777_s12, %s1777_s12 }
  0x64   :  { %1430 = vmatprep.subr.bf16.mxu1 %v1587_v36  ;;  %v1632_v34 = vld [vmem:[#allocation7 + $0x2d8] ss:$12 sps:$4 sm:$0xff]  }
  0x65   :  { %v1633_v36 = vld [vmem:[#allocation7 + $0x218] ss:$12 sps:$4 sm:$0xff]   ;;  %p1784_p7 = por %p1783_p6, %p1782_p5 }
  0x66   :  { %842 = vmatpush1.bf16.msra.mxu0 %v1550_v28  ;;  %v1623_v28 = vld [vmem:[#allocation7 + $0x1e8] ss:$12 sps:$4 sm:$0xff]  }
  0x67   :  { %843 = vmatprep.subr.bf16.mxu0 %v1555_v31  ;;  %1431 = vmatpush3.bf16.msra.mxu1 %v1588_v39  ;;  %v1624_v31 = vld [vmem:[#allocation7 + $0x1f8] ss:$12 sps:$4 sm:$0xff]   ;;  %p1785_p8 = pnand %p1784_p7, %p1778_p4 }
  0x68   :  { %1432 = vmatprep.subr.bf16.mxu1 %v1592_v40  ;;  %v1634_v40 = vld [vmem:[#allocation7 + $0x228] ss:$12 sps:$4 sm:$0xff]  }
  0x6a   :  { %844 = vmatpush1.bf16.msra.mxu0 %v1553_v32  ;;  %v1628_v32 = vld [vmem:[#allocation7 + $0x200] ss:$12 sps:$4 sm:$0xff]  }
  0x6b   :  { %845 = vmatprep.subr.bf16.mxu0 %v1558_v35  ;;  %1433 = vmatpush3.bf16.msra.mxu1 %v1593_v42  ;;  %v1629_v35 = vld [vmem:[#allocation7 + $0x210] ss:$12 sps:$4 sm:$0xff]  }
  0x6c   :  { %1434 = vmatprep.subr.bf16.mxu1 %v1597_v56  ;;  %v1641_v42 = vld [vmem:[#allocation7 + $0x244] ss:$12 sps:$4 sm:$0xff]  }
  0x6d   :  { %v1657_v56 = vld [vmem:[#allocation7 + $0x2d0] ss:$12 sps:$4 sm:$0xff]  }
  0x6e   :  { %846 = vmatpush1.bf16.msra.mxu0 %v1556_v37  ;;  %v1636_v37 = vld [vmem:[#allocation7 + $0x22c] ss:$12 sps:$4 sm:$0xff]  }
  0x6f   :  { %847 = vmatprep.subr.bf16.mxu0 %v1561_v38  ;;  %1435 = vmatpush3.bf16.msra.mxu1 %v1598_v58  ;;  %v1637_v38 = vld [vmem:[#allocation7 + $0x2f0] ss:$12 sps:$4 sm:$0xff]   ;;  %v1660_v58 = vld [vmem:[#allocation7 + $0x2e8] ss:$12 sps:$4 sm:$0xff]  }
  0x70   :  { %1442 = vmatprep.subr.bf16.mxu1 %v1602_v60  ;;  %v1664_v60 = vld [vmem:[#allocation8] sm:$0xff]  }
  0x72   :  { %848 = vmatpush1.bf16.msra.mxu0 %v1559_v41  ;;  %v1638_v41 = vld [vmem:[#allocation7 + $0x230] ss:$12 sps:$4 sm:$0xff]  }
  0x73   :  { %849 = vmatprep.subr.bf16.mxu0 %v1566_v43 }
  0x76   :  { %850 = vmatpush1.bf16.msra.mxu0 %v1564_v44  ;;  %v1639_v44 = vld [vmem:[#allocation7 + $0x240] ss:$12 sps:$4 sm:$0xff]  }
  0x77   :  { %851 = vmatprep.subr.bf16.mxu0 %v1571_v45  ;;  %v1644_v45 = vld [vmem:[#allocation7 + $0x25c] ss:$12 sps:$4 sm:$0xff]  }
  0x7a   :  { %852 = vmatpush1.bf16.msra.mxu0 %v1569_v46  ;;  %v1642_v46 = vld [vmem:[#allocation7 + $0x258] ss:$12 sps:$4 sm:$0xff]  }
  0x7b   :  { %853 = vmatprep.subr.bf16.mxu0 %v1576_v47  ;;  %v1647_v47 = vld [vmem:[#allocation7 + $0x274] ss:$12 sps:$4 sm:$0xff]  }
  0x7e   :  { %854 = vmatpush1.bf16.msra.mxu0 %v1574_v48  ;;  %v1645_v48 = vld [vmem:[#allocation7 + $0x270] ss:$12 sps:$4 sm:$0xff]  }
  0x7f   :  { %855 = vmatprep.subr.bf16.mxu0 %v1581_v49  ;;  %v1650_v49 = vld [vmem:[#allocation7 + $0x28c] ss:$12 sps:$4 sm:$0xff]  }
  0x82   :  { %856 = vmatpush1.bf16.msra.mxu0 %v1579_v50  ;;  %v1648_v50 = vld [vmem:[#allocation7 + $0x288] ss:$12 sps:$4 sm:$0xff]  }
  0x83   :  { %857 = vmatprep.subr.bf16.mxu0 %v1586_v51  ;;  %v1653_v51 = vld [vmem:[#allocation7 + $0x2a4] ss:$12 sps:$4 sm:$0xff]  }
  0x86   :  { %858 = vmatpush1.bf16.msra.mxu0 %v1584_v52  ;;  %v1651_v52 = vld [vmem:[#allocation7 + $0x2a0] ss:$12 sps:$4 sm:$0xff]  }
  0x87   :  { %859 = vmatprep.subr.bf16.mxu0 %v1591_v53  ;;  %v1656_v53 = vld [vmem:[#allocation7 + $0x2bc] ss:$12 sps:$4 sm:$0xff]  }
  0x8a   :  { %860 = vmatpush1.bf16.msra.mxu0 %v1589_v54  ;;  %v1654_v54 = vld [vmem:[#allocation7 + $0x2b8] ss:$12 sps:$4 sm:$0xff]  }
  0x8b   :  { %861 = vmatprep.subr.bf16.mxu0 %v1596_v55  ;;  %v1659_v55 = vld [vmem:[#allocation7 + $0x2d4] ss:$12 sps:$4 sm:$0xff]  }
  0x8e   :  { %862 = vmatpush1.bf16.msra.mxu0 %v1594_v57  ;;  %v1662_v57 = vld [vmem:[#allocation7 + $0x2ec] ss:$12 sps:$4 sm:$0xff]  }
  0x8f   :  { %872 = vmatprep.subr.bf16.mxu0 %v1601_v59  ;;  %v1663_v59 = vld [vmem:[#allocation8 + $0x40] sm:$0xff]  }
 0x124   :  { %v135_v61 = vpop.f32.mrb[0].mxu0 }
 0x125   :  { %v183_v62 = vmax.f32 %v135_v61, 0.0  ;;  %v137_v63 = vpop.f32.mrb[1].mxu0  ;;  %v1892_v0 = vpop.f32.mrb[0].mxu1  ;;  %v1665_v61 = vld [vmem:[#allocation8 + $0x48] sm:$0xff]  }
 0x126   :  { %v184_v1 = vmax.f32 %v137_v63, 0.0  ;;  %v139_v2 = vpop.f32.mrb[2].mxu0  ;;  %v178_v3 = vpop.f32.mrb[1].mxu1  ;;  %v185_v39 = vmax.f32 %v1892_v0, 0.0  ;;  %v1667_v63 = vld [vmem:[#allocation8 + $0x50] sm:$0xff]  }
 0x127   :  { %v140_v4 = vpop.f32.mrb[3].mxu0  ;;  %v186_v5 = vmax.f32 %v178_v3, 0.0  ;;  %v180_v6 = vpop.f32.mrb[2].mxu1  ;;  %v187_v11 = vpack.c.bf16 %v183_v62, %v183_v62  ;;  %v1666_v62 = vld [vmem:[#allocation8 + $0x8] sm:$0xff]   ;;  %v1668_v0 = vld [vmem:[#allocation8 + $0x10] sm:$0xff]   ;;  %v1670_v2 = vld [vmem:[#allocation8 + $0x18] sm:$0xff]  }
 0x128   :  { %v188_v7 = vpack.c.bf16 %v184_v1, %v184_v1  ;;  %v181_v10 = vpop.f32.mrb[3].mxu1  ;;  %v189_v43 = vpack.c.bf16 %v185_v39, %v185_v39  ;;  %v1669_v1 = vld [vmem:[#allocation8 + $0x58] sm:$0xff]   ;;  %v1671_v3 = vld [vmem:[#allocation8 + $0x60] sm:$0xff]   ;;  %v1674_v6 = vld [vmem:[#allocation8 + $0x28] sm:$0xff]  }
 0x129   :  { %v190_v14 = vpack.c.bf16 %v186_v5, %v186_v5  ;;  %v1672_v4 = vld [vmem:[#allocation8 + $0x20] sm:$0xff]   ;;  %v1673_v5 = vld [vmem:[#allocation8 + $0x68] sm:$0xff]   ;;  %v1678_v10 = vld [vmem:[#allocation8 + $0x38] sm:$0xff]  }
 0x12a   :  { %863 = vmatprep.mubr.bf16.mxu0 %v188_v7  ;;  %945 = vmatprep.mubr.bf16.mxu1 %v188_v7  ;;  %v1675_v7 = vld [vmem:[#allocation8 + $0x70] sm:$0xff]  }
 0x12b   :  { %864 = vmatmul.mubr.bf16.vlgmr.msra.gmra.mrb[4].mxu0 %v187_v11  ;;  %946 = vmatmul.mubr.bf16.vlgmr.msra.gmra.mrb[4].mxu1 %v187_v11  ;;  %v1816_v11 = vmov 0.0  }
 0x12c   :  { %873 = vmatpush1.bf16.msra.mxu0 %v1599_v8  ;;  %1443 = vmatpush3.bf16.msra.mxu1 %v1603_v9  ;;  %v1676_v8 = vld [vmem:[#allocation8 + $0x30] sm:$0xff]   ;;  %v1677_v9 = vld [vmem:[#allocation8 + $0x78] sm:$0xff]  }
 0x12d   :  { %874 = vmatprep.subr.bf16.mxu0 %v1606_v12  ;;  %1444 = vmatprep.subr.bf16.mxu1 %v1607_v13 }
 0x12e   :  { %985 = vmatprep.mubr.bf16.mxu1 %v190_v14  ;;  %904 = vmatprep.mubr.bf16.mxu0 %v190_v14 }
 0x130   :  { %875 = vmatpush1.bf16.msra.mxu0 %v1604_v15  ;;  %1445 = vmatpush3.bf16.msra.mxu1 %v1608_v16 }
 0x131   :  { %876 = vmatprep.subr.bf16.mxu0 %v1611_v17  ;;  %1446 = vmatprep.subr.bf16.mxu1 %v1612_v18 }
 0x134   :  { %877 = vmatpush1.bf16.msra.mxu0 %v1609_v19  ;;  %1447 = vmatpush3.bf16.msra.mxu1 %v1613_v20 }
 0x135   :  { %878 = vmatprep.subr.bf16.mxu0 %v1616_v21  ;;  %1448 = vmatprep.subr.bf16.mxu1 %v1617_v22 }
 0x138   :  { %879 = vmatpush1.bf16.msra.mxu0 %v1614_v23  ;;  %1449 = vmatpush3.bf16.msra.mxu1 %v1618_v24 }
 0x139   :  { %880 = vmatprep.subr.bf16.mxu0 %v1621_v25  ;;  %1450 = vmatprep.subr.bf16.mxu1 %v1622_v26 }
 0x13c   :  { %881 = vmatpush1.bf16.msra.mxu0 %v1619_v27  ;;  %1451 = vmatpush3.bf16.msra.mxu1 %v1623_v28 }
 0x13d   :  { %882 = vmatprep.subr.bf16.mxu0 %v1626_v29  ;;  %1452 = vmatprep.subr.bf16.mxu1 %v1627_v30  ;;  %v1679_v30 = vld [vmem:[#allocation8 + $0x80] sm:$0xff]  }
 0x140   :  { %883 = vmatpush1.bf16.msra.mxu0 %v1624_v31  ;;  %1453 = vmatpush3.bf16.msra.mxu1 %v1628_v32  ;;  %v1680_v32 = vld [vmem:[#allocation8 + $0x88] sm:$0xff]  }
 0x141   :  { %884 = vmatprep.subr.bf16.mxu0 %v1631_v33  ;;  %1454 = vmatprep.subr.bf16.mxu1 %v1632_v34  ;;  %v1681_v33 = vld [vmem:[#allocation8 + $0x90] sm:$0xff]   ;;  %v1682_v34 = vld [vmem:[#allocation8 + $0x98] sm:$0xff]  }
 0x144   :  { %885 = vmatpush1.bf16.msra.mxu0 %v1629_v35  ;;  %1455 = vmatpush3.bf16.msra.mxu1 %v1633_v36  ;;  %v1683_v35 = vld [vmem:[#allocation8 + $0xa0] sm:$0xff]   ;;  %v1684_v36 = vld [vmem:[#allocation8 + $0xa8] sm:$0xff]  }
 0x145   :  { %886 = vmatprep.subr.bf16.mxu0 %v1636_v37  ;;  %1456 = vmatprep.subr.bf16.mxu1 %v1637_v38  ;;  %v1685_v37 = vld [vmem:[#allocation8 + $0xb0] sm:$0xff]   ;;  %v1686_v38 = vld [vmem:[#allocation8 + $0xb8] sm:$0xff]  }
 0x148   :  { %887 = vmatpush1.bf16.msra.mxu0 %v1634_v40  ;;  %1457 = vmatpush3.bf16.msra.mxu1 %v1638_v41 }
 0x149   :  { %888 = vmatprep.subr.bf16.mxu0 %v1641_v42  ;;  %1464 = vmatprep.subr.bf16.mxu1 %v1663_v59 }
 0x14b   :  { %986 = vmatmul.mubr.bf16.vlgmr.msra.gmra.mrb[8].mxu1 %v189_v43 }
 0x14c   :  { %889 = vmatpush1.bf16.msra.mxu0 %v1639_v44  ;;  %1465 = vmatpush3.bf16.msra.mxu1 %v1664_v60 }
 0x14d   :  { %890 = vmatprep.subr.bf16.mxu0 %v1644_v45  ;;  %1466 = vmatprep.subr.bf16.mxu1 %v1665_v61 }
 0x150   :  { %891 = vmatpush1.bf16.msra.mxu0 %v1642_v46  ;;  %1467 = vmatpush3.bf16.msra.mxu1 %v1666_v62 }
 0x151   :  { %892 = vmatprep.subr.bf16.mxu0 %v1647_v47  ;;  %1468 = vmatprep.subr.bf16.mxu1 %v1667_v63 }
 0x154   :  { %893 = vmatpush1.bf16.msra.mxu0 %v1645_v48  ;;  %1469 = vmatpush3.bf16.msra.mxu1 %v1668_v0 }
 0x155   :  { %894 = vmatprep.subr.bf16.mxu0 %v1650_v49  ;;  %1470 = vmatprep.subr.bf16.mxu1 %v1669_v1 }
 0x158   :  { %895 = vmatpush1.bf16.msra.mxu0 %v1648_v50  ;;  %1471 = vmatpush3.bf16.msra.mxu1 %v1670_v2 }
 0x159   :  { %896 = vmatprep.subr.bf16.mxu0 %v1653_v51  ;;  %1472 = vmatprep.subr.bf16.mxu1 %v1671_v3 }
 0x15c   :  { %897 = vmatpush1.bf16.msra.mxu0 %v1651_v52  ;;  %1473 = vmatpush3.bf16.msra.mxu1 %v1672_v4 }
 0x15d   :  { %898 = vmatprep.subr.bf16.mxu0 %v1656_v53  ;;  %1474 = vmatprep.subr.bf16.mxu1 %v1673_v5 }
 0x160   :  { %899 = vmatpush1.bf16.msra.mxu0 %v1654_v54  ;;  %1475 = vmatpush3.bf16.msra.mxu1 %v1674_v6 }
 0x161   :  { %900 = vmatprep.subr.bf16.mxu0 %v1659_v55  ;;  %1476 = vmatprep.subr.bf16.mxu1 %v1675_v7 }
 0x164   :  { %901 = vmatpush1.bf16.msra.mxu0 %v1657_v56  ;;  %1477 = vmatpush3.bf16.msra.mxu1 %v1676_v8 }
 0x165   :  { %902 = vmatprep.subr.bf16.mxu0 %v1662_v57  ;;  %1478 = vmatprep.subr.bf16.mxu1 %v1677_v9 }
 0x168   :  { %903 = vmatpush1.bf16.msra.mxu0 %v1660_v58  ;;  %1479 = vmatpush3.bf16.msra.mxu1 %v1678_v10 }
 0x169   :  { %1495 = vmatprep.subr.bf16.mxu1 %v1816_v11 }
 0x16b   :  { %905 = vmatmul.mubr.bf16.vlgmr.msra.gmra.mrb[4].mxu0 %v189_v43 }
 0x1fe   :  { %v1436_v12 = vpop.f32.mrb[4].mxu1 }
 0x1ff   :  { %v1437_v13 = vpop.f32.mrb[5].mxu1 }
 0x200   :  { %v1438_v14 = vadd.f32 %v1437_v13, %v1436_v12  ;;  %v1439_v15 = vpop.f32.mrb[6].mxu1 }
 0x201   :  { %v1440_v16 = vpop.f32.mrb[7].mxu1 }
 0x21e   :  { %v1458_v17 = vpop.f32.mrb[8].mxu1 }
 0x21f   :  { %v1459_v18 = vpop.f32.mrb[9].mxu1 }
 0x220   :  { %v1460_v19 = vadd.f32 %v1459_v18, %v1458_v17  ;;  %v1461_v20 = vpop.f32.mrb[10].mxu1 }
 0x221   :  { %v1462_v21 = vpop.f32.mrb[11].mxu1 }
 0x222   :  { %v988_v22 = vadd.f32 %v1460_v19, %v1438_v14 }
 0x224   :  { %v995_v39 = vmax.f32 %v988_v22, 0.0 }
 0x226   :  { %v998_v40 = vpack.c.bf16 %v995_v39, %v995_v39 }
 0x23e   :  { %v906_v23 = vpop.f32.mrb[4].mxu0 }
 0x23f   :  { %v993_v24 = vmax.f32 %v906_v23, 0.0  ;;  %v908_v25 = vpop.f32.mrb[5].mxu0 }
 0x240   :  { %v994_v26 = vmax.f32 %v908_v25, 0.0  ;;  %v910_v27 = vpop.f32.mrb[6].mxu0 }
 0x241   :  { %v911_v28 = vpop.f32.mrb[7].mxu0  ;;  %v996_v31 = vpack.c.bf16 %v993_v24, %v993_v24 }
 0x242   :  { %v997_v29 = vpack.c.bf16 %v994_v26, %v994_v26 }
 0x244   :  { %1223 = vmatprep.mubr.bf16.mxu1 %v997_v29 }
 0x245   :  { %1224 = vmatmul.mubr.bf16.vlgmr.msra.gmra.mrb[12].mxu1 %v996_v31 }
 0x246   :  { %1496 = vmatpush3.bf16.msra.mxu1 %v1679_v30  ;;  %1511 = vmatprep.mubr.msk.bf16.mxu1 %vm1817_vm2, %v1816_v11 }
 0x247   :  { %1497 = vmatprep.subr.bf16.mxu1 %v1816_v11 }
 0x24a   :  { %1498 = vmatpush3.bf16.msra.mxu1 %v1680_v32 }
 0x24b   :  { %1499 = vmatprep.subr.bf16.mxu1 %v1816_v11 }
 0x24e   :  { %1500 = vmatpush3.bf16.msra.mxu1 %v1681_v33 }
 0x24f   :  { %1501 = vmatprep.subr.bf16.mxu1 %v1816_v11 }
 0x252   :  { %1502 = vmatpush3.bf16.msra.mxu1 %v1682_v34 }
 0x253   :  { %1503 = vmatprep.subr.bf16.mxu1 %v1816_v11 }
 0x256   :  { %1504 = vmatpush3.bf16.msra.mxu1 %v1683_v35 }
 0x257   :  { %1505 = vmatprep.subr.bf16.mxu1 %v1816_v11 }
 0x25a   :  { %1506 = vmatpush3.bf16.msra.mxu1 %v1684_v36 }
 0x25b   :  { %1507 = vmatprep.subr.bf16.mxu1 %v1816_v11 }
 0x25e   :  { %1508 = vmatpush3.bf16.msra.mxu1 %v1685_v37 }
 0x25f   :  { %1509 = vmatprep.subr.bf16.mxu1 %v1816_v11 }
 0x262   :  { %1510 = vmatpush3.bf16.msra.mxu1 %v1686_v38 }
 0x265   :  { %1512 = vmatmul.mubr.bf16.vlgmr.msra.gmra.mrb[16].mxu1 %v998_v40 }
 0x318   :  { %v1480_v41 = vpop.f32.mrb[12].mxu1 }
 0x319   :  { %v1481_v42 = vpop.f32.mrb[13].mxu1 }
 0x31a   :  { %v1482_v43 = vadd.f32 %v1481_v42, %v1480_v41  ;;  %v1483_v44 = vpop.f32.mrb[14].mxu1 }
 0x31b   :  { %v1484_v45 = vpop.f32.mrb[15].mxu1 }
 0x338   :  { %v1265_v46 = vpop.f32.mrb[16].mxu1 }
 0x339   :  { %v1266_v47 = vadd.f32 %v1482_v43, %v1265_v46  ;;  %v1513_v48 = vpop.f32.mrb[17].mxu1 }
 0x33a   :  { %v1268_v49 = vpop.f32.mrb[18].mxu1 }
 0x33b   :  { %1687 = vtanh.f32 %v1266_v47  ;;  %v1514_v50 = vpop.f32.mrb[19].mxu1 }
 0x345   :  { %v1688_v51 = vpop.eup %1687 }
 0x346   :  { %v1272_v52 = vmul.f32 2.0, %v1688_v51 }
 0x348   :  { %v1273_v53 = vpack.c.bf16 %v1272_v52, %v1272_v52 }
 0x34a   :  { %1274 = vst [vmem:[#allocation10] sm:$0xf] %v1273_v53 }
 0x34b   :  { %1788 = shalt.err (!%p1785_p8)
}
 0x34c   :  { %s1789_s15 = scalar_lea.hbm %s1911_s4, 64 }
 0x34d   :  { %p1790_p9 = scmp.ne.s32.totalorder %s1911_s4, %s1789_s15  ;;  %p1793_p10 = scmp.lt.u32.totalorder %s1789_s15, %s1911_s4 }
 0x34f   :  { %p1795_p11 = pnand %p1793_p10, %p1790_p9 }
 0x351   :  { %1798 = shalt.err (!%p1795_p11)
}
 0x352   :  { %1284 = dma.vmem_to_hbm [thread:$0]  %s1282_s11, 64, %s1911_s4, [#allocation4]  }
 0x353   :  { %1805 = dma.done.wait [#allocation4], 64  }
 0x354   :  { %1806 = vsyncadd [#allocation4], 4294967232 }
 0x355   :  { %1288 = vsyncpa [#allocation3], 1 }
 0x356   :  { %1289 = vsyncpa [#allocation6], 1 }
 0x357   :  { %1290 = vsyncpa [#allocation9], 1 }
 0x358   :  { %1291 = vsyncpa [#allocation4], 1 }

</bundles_post_ra>
